<compile_context>
chip_gen: v7x
topology: tpu7x:2x2x1
jax: 0.10.0
libtpu: 0.0.40
codegen_flags: <defaults>
</compile_context>

<pallas_src>
import functools

import jax
import jax.numpy as jnp
from jax import lax
from jax.experimental import pallas as pl
from jax.experimental.pallas import tpu as pltpu

HEADS = 2            # GATConv(heads=2)
NEG_SLOPE = 0.2      # PyG GATConv default negative_slope
MASK_NEG = -1e30     # additive mask for non-edges


# ---------------------------------------------------------------------------
# In-kernel building block: one dense-masked GAT layer (+ fused ReLU)
# ---------------------------------------------------------------------------
def _gat_layer(x, mask_bias, w, att_src_blk, att_dst, bias, *, heads, fo):
    """x[N,Fin], mask_bias[N,N] (0 on edges j->i incl. self-loops, -1e30 else),
    w[Fin,heads*fo], att_src_blk[heads,heads*fo] (block-diagonal),
    att_dst[heads,fo], bias[1,fo]  ->  relu(GATConv(x)) [N,fo]."""
    n = x.shape[0]

    # One MXU pass for all heads' linear transform: [N, heads*fo].
    xw_all = jnp.dot(x, w, preferred_element_type=jnp.float32)

    # Source scores for both heads in one small matmul, already lane-oriented:
    # src_rows[h, j] = att_src[h] . xw_j^{(h)}            -> [heads, N]
    src_rows = lax.dot_general(att_src_blk, xw_all, (((1,), (1,)), ((), ())),
                               preferred_element_type=jnp.float32)

    alphas, xws = [], []
    for h in range(heads):                      # static unroll (heads = 2)
        xw = xw_all[:, h * fo:(h + 1) * fo]     # static slice
        # Destination scores on the VPU + lane reduce: [N, 1].
        dst_col = jnp.sum(xw * att_dst[h:h + 1, :], axis=-1, keepdims=True)
        logits = dst_col + src_rows[h:h + 1, :]                      # [N, N]
        logits = jnp.where(logits > 0, logits, NEG_SLOPE * logits)   # leaky_relu
        logits = logits + mask_bias                                  # additive mask
        m = jnp.max(logits, axis=1, keepdims=True)
        p = jnp.exp(logits - m)
        alphas.append(p / jnp.sum(p, axis=1, keepdims=True))         # exact softmax
        xws.append(xw)

    # Merge both heads' aggregation into ONE block matmul:
    #   [alpha0 | alpha1] (N x heads*N)  @  [xw0 ; xw1] (heads*N x fo)
    alpha_cat = jnp.concatenate(alphas, axis=1)           # [N, heads*N]
    xw_stack = jnp.concatenate(xws, axis=0)               # [heads*N, fo]
    out = jnp.dot(alpha_cat, xw_stack, preferred_element_type=jnp.float32)
    out = out * (1.0 / heads) + bias                      # head mean + bias
    return jnp.maximum(out, 0.0)                          # fused F.relu


# ---------------------------------------------------------------------------
# Fused kernel: build mask/pool -> GAT1 -> GAT2 -> mean-pool -> heads -> softmax
# ---------------------------------------------------------------------------
def _task_gnn_kernel(x_ref, ei_ref, batch_ref, wmat_ref, slab_ref, out_ref, *,
                     input_dim, hidden, heads, c0, c1, c2):
    n = x_ref.shape[0]
    e = ei_ref.shape[1]
    g = out_ref.shape[0]
    h2 = heads * hidden
    nc = c0 + c1 + c2

    # ---- additive adjacency mask built in-kernel (no XLA scatter / HBM mask) ----
    src = ei_ref[0:1, :]                                  # [1, E] int32 sources
    dst = ei_ref[1:2, :]                                  # [1, E] int32 targets
    node_iota = lax.broadcasted_iota(jnp.int32, (n, e), 0)
    dst_match = (node_iota == dst).astype(jnp.float32)    # [N, E]
    src_match = (node_iota == src).astype(jnp.float32)    # [N, E]
    # adj[i, j] = #edges j->i   (one tiny MXU pass)
    adj = lax.dot_general(dst_match, src_match, (((1,), (1,)), ((), ())),
                          preferred_element_type=jnp.float32)
    eye = (lax.broadcasted_iota(jnp.int32, (n, n), 0) ==
           lax.broadcasted_iota(jnp.int32, (n, n), 1)).astype(jnp.float32)
    mask_bias = jnp.where(adj + eye > 0.0, 0.0, MASK_NEG)  # self-loops included

    # ---- mean-pool matrix built in-kernel from the batch vector ----
    b_row = batch_ref[...]                                 # [1, N] int32
    onehot = (lax.broadcasted_iota(jnp.int32, (g, n), 0) == b_row).astype(jnp.float32)
    counts = jnp.sum(onehot, axis=1, keepdims=True)
    pool = onehot / jnp.maximum(counts, 1.0)               # [G, N]

    # ---- packed parameters: static slices of the two slabs ----
    w1 = wmat_ref[0:input_dim, 0:h2]                       # [Fin, heads*hidden]
    w2 = wmat_ref[:, h2:2 * h2]                            # [hidden, heads*hidden]
    wh = wmat_ref[:, 2 * h2:2 * h2 + nc]                   # [hidden, nc]

    as1 = slab_ref[0:heads, 0:h2]
    ad1 = slab_ref[heads:2 * heads, 0:hidden]
    b1 = slab_ref[2 * heads:2 * heads + 1, 0:hidden]
    off = 2 * heads + 1
    as2 = slab_ref[off:off + heads, 0:h2]
    ad2 = slab_ref[off + heads:off + 2 * heads, 0:hidden]
    b2 = slab_ref[off + 2 * heads:off + 2 * heads + 1, 0:hidden]
    bh = slab_ref[off + 2 * heads + 1:off + 2 * heads + 2, 0:nc]

    # ---- two GAT layers (the [N, hidden] intermediate never leaves VMEM) ----
    h = _gat_layer(x_ref[...], mask_bias, w1, as1, ad1, b1, heads=heads, fo=hidden)
    h = _gat_layer(h, mask_bias, w2, as2, ad2, b2, heads=heads, fo=hidden)

    # ---- global_mean_pool + all three classifier heads in one MXU pass ----
    pooled = jnp.dot(pool, h, preferred_element_type=jnp.float32)        # [G, hidden]
    logits = jnp.dot(pooled, wh, preferred_element_type=jnp.float32) + bh  # [G, nc]

    def _softmax(z):                                       # exact: rows sum to 1
        m = jnp.max(z, axis=1, keepdims=True)
        p = jnp.exp(z - m)
        return p / jnp.sum(p, axis=1, keepdims=True)

    out_ref[...] = jnp.concatenate(
        [_softmax(logits[:, 0:c0]),
         _softmax(logits[:, c0:c0 + c1]),
         _softmax(logits[:, c0 + c1:nc])], axis=1)         # single fused write


def task_gnn_fused(x, edge_index, batch_row, wmat, slab, *,
                   input_dim, hidden, num_graphs, c0, c1, c2):
    # TODO(synk): for batched multi-graph inference add a leading "parallel"
    # grid axis over graphs (dimension_semantics) so v7x's 2 TCs are both used.
    nc = c0 + c1 + c2
    vmem = pl.BlockSpec(memory_space=pltpu.MemorySpace.VMEM)
    kernel = functools.partial(_task_gnn_kernel, input_dim=input_dim,
                               hidden=hidden, heads=HEADS, c0=c0, c1=c1, c2=c2)
    fused = pl.pallas_call(
        kernel,
        out_shape=jax.ShapeDtypeStruct((num_graphs, nc), jnp.float32),
        in_specs=[vmem] * 5,
        out_specs=vmem,
    )(x, edge_index, batch_row, wmat, slab)
    # Wrapper-side splits are free XLA slices.
    return fused[:, 0:c0], fused[:, c0:c0 + c1], fused[:, c0 + c1:nc]


# ---------------------------------------------------------------------------
# Init-time parameter packing (hoisted OUT of the per-forward path)
# ---------------------------------------------------------------------------
def _block_att(att):
    """[heads, fo] -> [heads, heads*fo] block-diagonal layout."""
    heads, fo = att.shape
    blk = jnp.zeros((heads, heads * fo), att.dtype)
    for h in range(heads):
        blk = blk.at[h, h * fo:(h + 1) * fo].set(att[h])
    return blk


def _pad_cols(a, width):
    return jnp.pad(a, ((0, 0), (0, width - a.shape[1])))


def init_params(key, input_dim, hidden_dim, object_classes, goal_classes,
                action_classes):
    ks = jax.random.split(key, 11)
    s = 0.1
    h2 = HEADS * hidden_dim
    nc = object_classes + goal_classes + action_classes

    raw = {
        "w1": s * jax.random.normal(ks[0], (input_dim, h2), jnp.float32),
        "as1": s * jax.random.normal(ks[1], (HEADS, hidden_dim), jnp.float32),
        "ad1": s * jax.random.normal(ks[2], (HEADS, hidden_dim), jnp.float32),
        "b1": s * jax.random.normal(ks[3], (1, hidden_dim), jnp.float32),
        "w2": s * jax.random.normal(ks[4], (hidden_dim, h2), jnp.float32),
        "as2": s * jax.random.normal(ks[5], (HEADS, hidden_dim), jnp.float32),
        "ad2": s * jax.random.normal(ks[6], (HEADS, hidden_dim), jnp.float32),
        "b2": s * jax.random.normal(ks[7], (1, hidden_dim), jnp.float32),
        "wo": s * jax.random.normal(ks[8], (hidden_dim, object_classes), jnp.float32),
        "bo": jnp.zeros((1, object_classes), jnp.float32),
        "wg": s * jax.random.normal(ks[9], (hidden_dim, goal_classes), jnp.float32),
        "bg": jnp.zeros((1, goal_classes), jnp.float32),
        "wa": s * jax.random.normal(ks[10], (hidden_dim, action_classes), jnp.float32),
        "ba": jnp.zeros((1, action_classes), jnp.float32),
    }

    # One hidden-row matrix slab: [hidden, h2 (w1 zero-padded rows) | h2 (w2) | nc].
    w1_pad = jnp.zeros((hidden_dim, h2), jnp.float32).at[:input_dim].set(raw["w1"])
    w_heads = jnp.concatenate([raw["wo"], raw["wg"], raw["wa"]], axis=1)
    b_heads = jnp.concatenate([raw["bo"], raw["bg"], raw["ba"]], axis=1)
    wmat = jnp.concatenate([w1_pad, raw["w2"], w_heads], axis=1)

    # One small-parameter slab (rows: as1|ad1|b1|as2|ad2|b2|b_heads), padded to
    # a common lane width.
    width = max(h2, hidden_dim, nc)
    slab = jnp.concatenate([
        _pad_cols(_block_att(raw["as1"]), width),
        _pad_cols(raw["ad1"], width),
        _pad_cols(raw["b1"], width),
        _pad_cols(_block_att(raw["as2"]), width),
        _pad_cols(raw["ad2"], width),
        _pad_cols(raw["b2"], width),
        _pad_cols(b_heads, width),
    ], axis=0)

    return {"wmat": wmat, "slab": slab, "raw": raw}


def task_gnn_forward(params, x, edge_index, batch, *, input_dim, hidden,
                     num_graphs, c0, c1, c2):
    batch_row = batch.reshape(1, -1).astype(jnp.int32)     # [1, N]
    return task_gnn_fused(
        x, edge_index.astype(jnp.int32), batch_row,
        params["wmat"], params["slab"],
        input_dim=input_dim, hidden=hidden, num_graphs=num_graphs,
        c0=c0, c1=c1, c2=c2)


# ---------------------------------------------------------------------------
# Pure-JAX reference (mirrors PyG GATConv semantics) for validation
# ---------------------------------------------------------------------------
def reference_forward(raw, x, edge_index, batch, num_graphs):
    n = x.shape[0]
    src, dst = edge_index[0], edge_index[1]
    adj = jnp.zeros((n, n), jnp.float32).at[dst, src].set(1.0)
    adj = jnp.maximum(adj, jnp.eye(n, dtype=jnp.float32))
    mask_bias = jnp.where(adj > 0, 0.0, MASK_NEG)

    def gat(xin, w, a_s, a_d, b):
        heads, fo = a_d.shape
        xw = (xin @ w).reshape(n, heads, fo)
        src_sc = jnp.einsum("nhf,hf->hn", xw, a_s)
        dst_sc = jnp.einsum("nhf,hf->hn", xw, a_d)
        out = jnp.zeros((n, fo), jnp.float32)
        for h in range(heads):
            logits = dst_sc[h][:, None] + src_sc[h][None, :]
            logits = jnp.where(logits > 0, logits, NEG_SLOPE * logits) + mask_bias
            alpha = jax.nn.softmax(logits, axis=1)
            out = out + alpha @ xw[:, h, :]
        return jnp.maximum(out / heads + b, 0.0)

    h = gat(x, raw["w1"], raw["as1"], raw["ad1"], raw["b1"])
    h = gat(h, raw["w2"], raw["as2"], raw["ad2"], raw["b2"])
    onehot = (batch[None, :] == jnp.arange(num_graphs)[:, None]).astype(jnp.float32)
    pooled = (onehot @ h) / jnp.maximum(onehot.sum(1, keepdims=True), 1.0)
    obj = jax.nn.softmax(pooled @ raw["wo"] + raw["bo"], axis=1)
    goal = jax.nn.softmax(pooled @ raw["wg"] + raw["bg"], axis=1)
    act = jax.nn.softmax(pooled @ raw["wa"] + raw["ba"], axis=1)
    return obj, goal, act


# ---------------------------------------------------------------------------
if __name__ == "__main__":
    input_dim, hidden_dim = 5, 16
    object_classes, goal_classes, action_classes = 5, 10, 4
    n_nodes = 8

    key = jax.random.PRNGKey(0)
    k_x, k_p = jax.random.split(key)

    x = jax.random.normal(k_x, (n_nodes, input_dim), jnp.float32)
    # deterministic ring graph (both directions)
    src = jnp.concatenate([jnp.arange(n_nodes), (jnp.arange(n_nodes) + 1) % n_nodes])
    dst = jnp.concatenate([(jnp.arange(n_nodes) + 1) % n_nodes, jnp.arange(n_nodes)])
    edge_index = jnp.stack([src, dst]).astype(jnp.int32)      # [2, 16]
    batch = jnp.zeros((n_nodes,), jnp.int32)                  # single graph (as in module)
    num_graphs = 1

    params = init_params(k_p, input_dim, hidden_dim,
                         object_classes, goal_classes, action_classes)

    fwd = jax.jit(functools.partial(
        task_gnn_forward, input_dim=input_dim, hidden=hidden_dim,
        num_graphs=num_graphs, c0=object_classes, c1=goal_classes,
        c2=action_classes))

    obj_pred, goal_pred, act_pred = fwd(params, x, edge_index, batch)
    jax.block_until_ready((obj_pred, goal_pred, act_pred))

    # shape / sanity checks
    assert obj_pred.shape == (num_graphs, object_classes)
    assert goal_pred.shape == (num_graphs, goal_classes)
    assert act_pred.shape == (num_graphs, action_classes)
    for arr in (obj_pred, goal_pred, act_pred):
        assert bool(jnp.all(jnp.isfinite(arr)))
        assert bool(jnp.allclose(jnp.sum(arr, axis=1), 1.0, atol=1e-5))

    # numerical check against a pure-JAX reference of the same module
    ref = reference_forward(params["raw"], x, edge_index, batch, num_graphs)
    for got, want in zip((obj_pred, goal_pred, act_pred), ref):
        assert bool(jnp.allclose(got, want, atol=5e-3, rtol=5e-3))

    print("KERNEL_OK")
</pallas_src>

<mosaic_0001>
module attributes {stable_mosaic.version = 11 : i64} {
  func.func @_task_gnn_kernel(%arg0: memref<8x5xf32, #tpu.memory_space<vmem>>, %arg1: memref<2x16xi32, #tpu.memory_space<vmem>>, %arg2: memref<1x8xi32, #tpu.memory_space<vmem>>, %arg3: memref<16x83xf32, #tpu.memory_space<vmem>>, %arg4: memref<11x32xf32, #tpu.memory_space<vmem>>, %arg5: memref<1x19xf32, #tpu.memory_space<vmem>>) attributes {dimension_semantics = [], scalar_prefetch = 0 : i64, scratch_operands = 0 : i64, tpu.core_type = #tpu.core_type<tc>} {
    %c0 = arith.constant 0 : index
    %c0_0 = arith.constant 0 : index
    %0 = vector.load %arg1[%c0, %c0_0] : memref<2x16xi32, #tpu.memory_space<vmem>>, vector<1x16xi32>
    %c1 = arith.constant 1 : index
    %c0_1 = arith.constant 0 : index
    %1 = vector.load %arg1[%c1, %c0_1] : memref<2x16xi32, #tpu.memory_space<vmem>>, vector<1x16xi32>
    %2 = tpu.iota {dimensions = array<i32: 0>} : vector<8x16xi32>
    %3 = vector.broadcast %1 : vector<1x16xi32> to vector<8x16xi32>
    %4 = arith.cmpi eq, %2, %3 : vector<8x16xi32>
    %5 = arith.extui %4 : vector<8x16xi1> to vector<8x16xi32>
    %6 = arith.sitofp %5 : vector<8x16xi32> to vector<8x16xf32>
    %7 = vector.broadcast %0 : vector<1x16xi32> to vector<8x16xi32>
    %8 = arith.cmpi eq, %2, %7 : vector<8x16xi32>
    %9 = arith.extui %8 : vector<8x16xi1> to vector<8x16xi32>
    %10 = arith.sitofp %9 : vector<8x16xi32> to vector<8x16xf32>
    %cst = arith.constant dense<0.000000e+00> : vector<8x8xf32>
    %11 = tpu.matmul %6, %10, %cst {dimension_numbers = #tpu.dot_dimension_numbers<[1], [1], [0], [0], [0, 0, 1, 0], [], []>} : vector<8x16xf32>, vector<8x16xf32>, vector<8x8xf32> -> vector<8x8xf32>
    %12 = tpu.iota {dimensions = array<i32: 0>} : vector<8x8xi32>
    %13 = tpu.iota {dimensions = array<i32: 1>} : vector<8x8xi32>
    %14 = arith.cmpi eq, %12, %13 : vector<8x8xi32>
    %15 = arith.extui %14 : vector<8x8xi1> to vector<8x8xi32>
    %16 = arith.sitofp %15 : vector<8x8xi32> to vector<8x8xf32>
    %17 = arith.addf %11, %16 : vector<8x8xf32>
    %cst_2 = arith.constant 0.000000e+00 : f32
    %18 = vector.broadcast %cst_2 : f32 to vector<8x8xf32>
    %19 = arith.cmpf ogt, %17, %18 : vector<8x8xf32>
    %cst_3 = arith.constant 0.000000e+00 : f32
    %cst_4 = arith.constant -1.000000e+30 : f32
    %20 = vector.broadcast %cst_3 : f32 to vector<8x8xf32>
    %21 = vector.broadcast %cst_4 : f32 to vector<8x8xf32>
    %22 = arith.select %19, %20, %21 : vector<8x8xi1>, vector<8x8xf32>
    %c0_5 = arith.constant 0 : index
    %c0_6 = arith.constant 0 : index
    %23 = vector.load %arg2[%c0_5, %c0_6] : memref<1x8xi32, #tpu.memory_space<vmem>>, vector<1x8xi32>
    %24 = tpu.iota {dimensions = array<i32: 0>} : vector<1x8xi32>
    %25 = arith.cmpi eq, %24, %23 : vector<1x8xi32>
    %26 = arith.extui %25 : vector<1x8xi1> to vector<1x8xi32>
    %27 = arith.sitofp %26 : vector<1x8xi32> to vector<1x8xf32>
    %cst_7 = arith.constant dense<0.000000e+00> : vector<1xf32>
    %28 = vector.multi_reduction <add>, %27, %cst_7 [1] : vector<1x8xf32> to vector<1xf32>
    %29 = vector.shape_cast %28 : vector<1xf32> to vector<1x1xf32>
    %cst_8 = arith.constant 1.000000e+00 : f32
    %30 = vector.broadcast %cst_8 : f32 to vector<1x1xf32>
    %31 = arith.maximumf %29, %30 : vector<1x1xf32>
    %32 = vector.broadcast %31 : vector<1x1xf32> to vector<1x8xf32>
    %33 = arith.divf %27, %32 : vector<1x8xf32>
    %c0_9 = arith.constant 0 : index
    %c0_10 = arith.constant 0 : index
    %34 = vector.load %arg3[%c0_9, %c0_10] : memref<16x83xf32, #tpu.memory_space<vmem>>, vector<5x32xf32>
    %c0_11 = arith.constant 0 : index
    %c32 = arith.constant 32 : index
    %35 = vector.load %arg3[%c0_11, %c32] : memref<16x83xf32, #tpu.memory_space<vmem>>, vector<16x32xf32>
    %c0_12 = arith.constant 0 : index
    %c64 = arith.constant 64 : index
    %36 = vector.load %arg3[%c0_12, %c64] : memref<16x83xf32, #tpu.memory_space<vmem>>, vector<16x19xf32>
    %c0_13 = arith.constant 0 : index
    %c0_14 = arith.constant 0 : index
    %37 = vector.load %arg4[%c0_13, %c0_14] : memref<11x32xf32, #tpu.memory_space<vmem>>, vector<2x32xf32>
    %c2 = arith.constant 2 : index
    %c0_15 = arith.constant 0 : index
    %38 = vector.load %arg4[%c2, %c0_15] : memref<11x32xf32, #tpu.memory_space<vmem>>, vector<2x16xf32>
    %c4 = arith.constant 4 : index
    %c0_16 = arith.constant 0 : index
    %39 = vector.load %arg4[%c4, %c0_16] : memref<11x32xf32, #tpu.memory_space<vmem>>, vector<1x16xf32>
    %c5 = arith.constant 5 : index
    %c0_17 = arith.constant 0 : index
    %40 = vector.load %arg4[%c5, %c0_17] : memref<11x32xf32, #tpu.memory_space<vmem>>, vector<2x32xf32>
    %c7 = arith.constant 7 : index
    %c0_18 = arith.constant 0 : index
    %41 = vector.load %arg4[%c7, %c0_18] : memref<11x32xf32, #tpu.memory_space<vmem>>, vector<2x16xf32>
    %c9 = arith.constant 9 : index
    %c0_19 = arith.constant 0 : index
    %42 = vector.load %arg4[%c9, %c0_19] : memref<11x32xf32, #tpu.memory_space<vmem>>, vector<1x16xf32>
    %c10 = arith.constant 10 : index
    %c0_20 = arith.constant 0 : index
    %43 = vector.load %arg4[%c10, %c0_20] : memref<11x32xf32, #tpu.memory_space<vmem>>, vector<1x19xf32>
    %c0_21 = arith.constant 0 : index
    %c0_22 = arith.constant 0 : index
    %44 = vector.load %arg0[%c0_21, %c0_22] : memref<8x5xf32, #tpu.memory_space<vmem>>, vector<8x5xf32>
    %cst_23 = arith.constant dense<0.000000e+00> : vector<8x32xf32>
    %45 = tpu.matmul %44, %34, %cst_23 {dimension_numbers = #tpu.dot_dimension_numbers<[1], [0], [0], [1], [0, 0, 1, 1], [], []>} : vector<8x5xf32>, vector<5x32xf32>, vector<8x32xf32> -> vector<8x32xf32>
    %cst_24 = arith.constant dense<0.000000e+00> : vector<2x8xf32>
    %46 = tpu.matmul %37, %45, %cst_24 {dimension_numbers = #tpu.dot_dimension_numbers<[1], [1], [0], [0], [0, 0, 1, 0], [], []>} : vector<2x32xf32>, vector<8x32xf32>, vector<2x8xf32> -> vector<2x8xf32>
    %47 = vector.extract_strided_slice %45 {offsets = [0, 0], sizes = [8, 16], strides = [1, 1]} : vector<8x32xf32> to vector<8x16xf32>
    %48 = vector.extract_strided_slice %38 {offsets = [0, 0], sizes = [1, 16], strides = [1, 1]} : vector<2x16xf32> to vector<1x16xf32>
    %49 = vector.broadcast %48 : vector<1x16xf32> to vector<8x16xf32>
    %50 = arith.mulf %47, %49 : vector<8x16xf32>
    %cst_25 = arith.constant dense<0.000000e+00> : vector<8xf32>
    %51 = vector.multi_reduction <add>, %50, %cst_25 [1] : vector<8x16xf32> to vector<8xf32>
    %52 = vector.shape_cast %51 : vector<8xf32> to vector<8x1xf32>
    %53 = vector.extract_strided_slice %46 {offsets = [0, 0], sizes = [1, 8], strides = [1, 1]} : vector<2x8xf32> to vector<1x8xf32>
    %54 = vector.broadcast %52 : vector<8x1xf32> to vector<8x8xf32>
    %55 = vector.broadcast %53 : vector<1x8xf32> to vector<8x8xf32>
    %56 = arith.addf %54, %55 : vector<8x8xf32>
    %cst_26 = arith.constant 0.000000e+00 : f32
    %57 = vector.broadcast %cst_26 : f32 to vector<8x8xf32>
    %58 = arith.cmpf ogt, %56, %57 : vector<8x8xf32>
    %cst_27 = arith.constant 2.000000e-01 : f32
    %59 = vector.broadcast %cst_27 : f32 to vector<8x8xf32>
    %60 = arith.mulf %59, %56 : vector<8x8xf32>
    %61 = arith.select %58, %56, %60 : vector<8x8xi1>, vector<8x8xf32>
    %62 = arith.addf %61, %22 : vector<8x8xf32>
    %cst_28 = arith.constant dense<0xFF800000> : vector<8xf32>
    %63 = vector.multi_reduction <maximumf>, %62, %cst_28 [1] : vector<8x8xf32> to vector<8xf32>
    %64 = vector.shape_cast %63 : vector<8xf32> to vector<8x1xf32>
    %65 = vector.broadcast %64 : vector<8x1xf32> to vector<8x8xf32>
    %66 = arith.subf %62, %65 : vector<8x8xf32>
    %67 = math.exp %66 : vector<8x8xf32>
    %cst_29 = arith.constant dense<0.000000e+00> : vector<8xf32>
    %68 = vector.multi_reduction <add>, %67, %cst_29 [1] : vector<8x8xf32> to vector<8xf32>
    %69 = vector.shape_cast %68 : vector<8xf32> to vector<8x1xf32>
    %70 = vector.broadcast %69 : vector<8x1xf32> to vector<8x8xf32>
    %71 = arith.divf %67, %70 : vector<8x8xf32>
    %72 = vector.extract_strided_slice %45 {offsets = [0, 16], sizes = [8, 16], strides = [1, 1]} : vector<8x32xf32> to vector<8x16xf32>
    %73 = vector.extract_strided_slice %38 {offsets = [1, 0], sizes = [1, 16], strides = [1, 1]} : vector<2x16xf32> to vector<1x16xf32>
    %74 = vector.broadcast %73 : vector<1x16xf32> to vector<8x16xf32>
    %75 = arith.mulf %72, %74 : vector<8x16xf32>
    %cst_30 = arith.constant dense<0.000000e+00> : vector<8xf32>
    %76 = vector.multi_reduction <add>, %75, %cst_30 [1] : vector<8x16xf32> to vector<8xf32>
    %77 = vector.shape_cast %76 : vector<8xf32> to vector<8x1xf32>
    %78 = vector.extract_strided_slice %46 {offsets = [1, 0], sizes = [1, 8], strides = [1, 1]} : vector<2x8xf32> to vector<1x8xf32>
    %79 = vector.broadcast %77 : vector<8x1xf32> to vector<8x8xf32>
    %80 = vector.broadcast %78 : vector<1x8xf32> to vector<8x8xf32>
    %81 = arith.addf %79, %80 : vector<8x8xf32>
    %cst_31 = arith.constant 0.000000e+00 : f32
    %82 = vector.broadcast %cst_31 : f32 to vector<8x8xf32>
    %83 = arith.cmpf ogt, %81, %82 : vector<8x8xf32>
    %cst_32 = arith.constant 2.000000e-01 : f32
    %84 = vector.broadcast %cst_32 : f32 to vector<8x8xf32>
    %85 = arith.mulf %84, %81 : vector<8x8xf32>
    %86 = arith.select %83, %81, %85 : vector<8x8xi1>, vector<8x8xf32>
    %87 = arith.addf %86, %22 : vector<8x8xf32>
    %cst_33 = arith.constant dense<0xFF800000> : vector<8xf32>
    %88 = vector.multi_reduction <maximumf>, %87, %cst_33 [1] : vector<8x8xf32> to vector<8xf32>
    %89 = vector.shape_cast %88 : vector<8xf32> to vector<8x1xf32>
    %90 = vector.broadcast %89 : vector<8x1xf32> to vector<8x8xf32>
    %91 = arith.subf %87, %90 : vector<8x8xf32>
    %92 = math.exp %91 : vector<8x8xf32>
    %cst_34 = arith.constant dense<0.000000e+00> : vector<8xf32>
    %93 = vector.multi_reduction <add>, %92, %cst_34 [1] : vector<8x8xf32> to vector<8xf32>
    %94 = vector.shape_cast %93 : vector<8xf32> to vector<8x1xf32>
    %95 = vector.broadcast %94 : vector<8x1xf32> to vector<8x8xf32>
    %96 = arith.divf %92, %95 : vector<8x8xf32>
    %97 = tpu.concatenate %71, %96 in 1 : vector<8x8xf32>, vector<8x8xf32> -> vector<8x16xf32>
    %98 = tpu.concatenate %47, %72 in 0 : vector<8x16xf32>, vector<8x16xf32> -> vector<16x16xf32>
    %cst_35 = arith.constant dense<0.000000e+00> : vector<8x16xf32>
    %99 = tpu.matmul %97, %98, %cst_35 {dimension_numbers = #tpu.dot_dimension_numbers<[1], [0], [0], [1], [0, 0, 1, 1], [], []>} : vector<8x16xf32>, vector<16x16xf32>, vector<8x16xf32> -> vector<8x16xf32>
    %cst_36 = arith.constant 5.000000e-01 : f32
    %100 = vector.broadcast %cst_36 : f32 to vector<8x16xf32>
    %101 = arith.mulf %99, %100 : vector<8x16xf32>
    %102 = vector.broadcast %39 : vector<1x16xf32> to vector<8x16xf32>
    %103 = arith.addf %101, %102 : vector<8x16xf32>
    %cst_37 = arith.constant 0.000000e+00 : f32
    %104 = vector.broadcast %cst_37 : f32 to vector<8x16xf32>
    %105 = arith.maximumf %103, %104 : vector<8x16xf32>
    %cst_38 = arith.constant dense<0.000000e+00> : vector<8x32xf32>
    %106 = tpu.matmul %105, %35, %cst_38 {dimension_numbers = #tpu.dot_dimension_numbers<[1], [0], [0], [1], [0, 0, 1, 1], [], []>} : vector<8x16xf32>, vector<16x32xf32>, vector<8x32xf32> -> vector<8x32xf32>
    %cst_39 = arith.constant dense<0.000000e+00> : vector<2x8xf32>
    %107 = tpu.matmul %40, %106, %cst_39 {dimension_numbers = #tpu.dot_dimension_numbers<[1], [1], [0], [0], [0, 0, 1, 0], [], []>} : vector<2x32xf32>, vector<8x32xf32>, vector<2x8xf32> -> vector<2x8xf32>
    %108 = vector.extract_strided_slice %106 {offsets = [0, 0], sizes = [8, 16], strides = [1, 1]} : vector<8x32xf32> to vector<8x16xf32>
    %109 = vector.extract_strided_slice %41 {offsets = [0, 0], sizes = [1, 16], strides = [1, 1]} : vector<2x16xf32> to vector<1x16xf32>
    %110 = vector.broadcast %109 : vector<1x16xf32> to vector<8x16xf32>
    %111 = arith.mulf %108, %110 : vector<8x16xf32>
    %cst_40 = arith.constant dense<0.000000e+00> : vector<8xf32>
    %112 = vector.multi_reduction <add>, %111, %cst_40 [1] : vector<8x16xf32> to vector<8xf32>
    %113 = vector.shape_cast %112 : vector<8xf32> to vector<8x1xf32>
    %114 = vector.extract_strided_slice %107 {offsets = [0, 0], sizes = [1, 8], strides = [1, 1]} : vector<2x8xf32> to vector<1x8xf32>
    %115 = vector.broadcast %113 : vector<8x1xf32> to vector<8x8xf32>
    %116 = vector.broadcast %114 : vector<1x8xf32> to vector<8x8xf32>
    %117 = arith.addf %115, %116 : vector<8x8xf32>
    %cst_41 = arith.constant 0.000000e+00 : f32
    %118 = vector.broadcast %cst_41 : f32 to vector<8x8xf32>
    %119 = arith.cmpf ogt, %117, %118 : vector<8x8xf32>
    %cst_42 = arith.constant 2.000000e-01 : f32
    %120 = vector.broadcast %cst_42 : f32 to vector<8x8xf32>
    %121 = arith.mulf %120, %117 : vector<8x8xf32>
    %122 = arith.select %119, %117, %121 : vector<8x8xi1>, vector<8x8xf32>
    %123 = arith.addf %122, %22 : vector<8x8xf32>
    %cst_43 = arith.constant dense<0xFF800000> : vector<8xf32>
    %124 = vector.multi_reduction <maximumf>, %123, %cst_43 [1] : vector<8x8xf32> to vector<8xf32>
    %125 = vector.shape_cast %124 : vector<8xf32> to vector<8x1xf32>
    %126 = vector.broadcast %125 : vector<8x1xf32> to vector<8x8xf32>
    %127 = arith.subf %123, %126 : vector<8x8xf32>
    %128 = math.exp %127 : vector<8x8xf32>
    %cst_44 = arith.constant dense<0.000000e+00> : vector<8xf32>
    %129 = vector.multi_reduction <add>, %128, %cst_44 [1] : vector<8x8xf32> to vector<8xf32>
    %130 = vector.shape_cast %129 : vector<8xf32> to vector<8x1xf32>
    %131 = vector.broadcast %130 : vector<8x1xf32> to vector<8x8xf32>
    %132 = arith.divf %128, %131 : vector<8x8xf32>
    %133 = vector.extract_strided_slice %106 {offsets = [0, 16], sizes = [8, 16], strides = [1, 1]} : vector<8x32xf32> to vector<8x16xf32>
    %134 = vector.extract_strided_slice %41 {offsets = [1, 0], sizes = [1, 16], strides = [1, 1]} : vector<2x16xf32> to vector<1x16xf32>
    %135 = vector.broadcast %134 : vector<1x16xf32> to vector<8x16xf32>
    %136 = arith.mulf %133, %135 : vector<8x16xf32>
    %cst_45 = arith.constant dense<0.000000e+00> : vector<8xf32>
    %137 = vector.multi_reduction <add>, %136, %cst_45 [1] : vector<8x16xf32> to vector<8xf32>
    %138 = vector.shape_cast %137 : vector<8xf32> to vector<8x1xf32>
    %139 = vector.extract_strided_slice %107 {offsets = [1, 0], sizes = [1, 8], strides = [1, 1]} : vector<2x8xf32> to vector<1x8xf32>
    %140 = vector.broadcast %138 : vector<8x1xf32> to vector<8x8xf32>
    %141 = vector.broadcast %139 : vector<1x8xf32> to vector<8x8xf32>
    %142 = arith.addf %140, %141 : vector<8x8xf32>
    %cst_46 = arith.constant 0.000000e+00 : f32
    %143 = vector.broadcast %cst_46 : f32 to vector<8x8xf32>
    %144 = arith.cmpf ogt, %142, %143 : vector<8x8xf32>
    %cst_47 = arith.constant 2.000000e-01 : f32
    %145 = vector.broadcast %cst_47 : f32 to vector<8x8xf32>
    %146 = arith.mulf %145, %142 : vector<8x8xf32>
    %147 = arith.select %144, %142, %146 : vector<8x8xi1>, vector<8x8xf32>
    %148 = arith.addf %147, %22 : vector<8x8xf32>
    %cst_48 = arith.constant dense<0xFF800000> : vector<8xf32>
    %149 = vector.multi_reduction <maximumf>, %148, %cst_48 [1] : vector<8x8xf32> to vector<8xf32>
    %150 = vector.shape_cast %149 : vector<8xf32> to vector<8x1xf32>
    %151 = vector.broadcast %150 : vector<8x1xf32> to vector<8x8xf32>
    %152 = arith.subf %148, %151 : vector<8x8xf32>
    %153 = math.exp %152 : vector<8x8xf32>
    %cst_49 = arith.constant dense<0.000000e+00> : vector<8xf32>
    %154 = vector.multi_reduction <add>, %153, %cst_49 [1] : vector<8x8xf32> to vector<8xf32>
    %155 = vector.shape_cast %154 : vector<8xf32> to vector<8x1xf32>
    %156 = vector.broadcast %155 : vector<8x1xf32> to vector<8x8xf32>
    %157 = arith.divf %153, %156 : vector<8x8xf32>
    %158 = tpu.concatenate %132, %157 in 1 : vector<8x8xf32>, vector<8x8xf32> -> vector<8x16xf32>
    %159 = tpu.concatenate %108, %133 in 0 : vector<8x16xf32>, vector<8x16xf32> -> vector<16x16xf32>
    %cst_50 = arith.constant dense<0.000000e+00> : vector<8x16xf32>
    %160 = tpu.matmul %158, %159, %cst_50 {dimension_numbers = #tpu.dot_dimension_numbers<[1], [0], [0], [1], [0, 0, 1, 1], [], []>} : vector<8x16xf32>, vector<16x16xf32>, vector<8x16xf32> -> vector<8x16xf32>
    %cst_51 = arith.constant 5.000000e-01 : f32
    %161 = vector.broadcast %cst_51 : f32 to vector<8x16xf32>
    %162 = arith.mulf %160, %161 : vector<8x16xf32>
    %163 = vector.broadcast %42 : vector<1x16xf32> to vector<8x16xf32>
    %164 = arith.addf %162, %163 : vector<8x16xf32>
    %cst_52 = arith.constant 0.000000e+00 : f32
    %165 = vector.broadcast %cst_52 : f32 to vector<8x16xf32>
    %166 = arith.maximumf %164, %165 : vector<8x16xf32>
    %cst_53 = arith.constant dense<0.000000e+00> : vector<1x16xf32>
    %167 = tpu.matmul %33, %166, %cst_53 {dimension_numbers = #tpu.dot_dimension_numbers<[1], [0], [0], [1], [0, 0, 1, 1], [], []>} : vector<1x8xf32>, vector<8x16xf32>, vector<1x16xf32> -> vector<1x16xf32>
    %cst_54 = arith.constant dense<0.000000e+00> : vector<1x19xf32>
    %168 = tpu.matmul %167, %36, %cst_54 {dimension_numbers = #tpu.dot_dimension_numbers<[1], [0], [0], [1], [0, 0, 1, 1], [], []>} : vector<1x16xf32>, vector<16x19xf32>, vector<1x19xf32> -> vector<1x19xf32>
    %169 = arith.addf %168, %43 : vector<1x19xf32>
    %170 = vector.extract_strided_slice %169 {offsets = [0, 0], sizes = [1, 5], strides = [1, 1]} : vector<1x19xf32> to vector<1x5xf32>
    %cst_55 = arith.constant dense<0xFF800000> : vector<1xf32>
    %171 = vector.multi_reduction <maximumf>, %170, %cst_55 [1] : vector<1x5xf32> to vector<1xf32>
    %172 = vector.shape_cast %171 : vector<1xf32> to vector<1x1xf32>
    %173 = vector.broadcast %172 : vector<1x1xf32> to vector<1x5xf32>
    %174 = arith.subf %170, %173 : vector<1x5xf32>
    %175 = math.exp %174 : vector<1x5xf32>
    %cst_56 = arith.constant dense<0.000000e+00> : vector<1xf32>
    %176 = vector.multi_reduction <add>, %175, %cst_56 [1] : vector<1x5xf32> to vector<1xf32>
    %177 = vector.shape_cast %176 : vector<1xf32> to vector<1x1xf32>
    %178 = vector.broadcast %177 : vector<1x1xf32> to vector<1x5xf32>
    %179 = arith.divf %175, %178 : vector<1x5xf32>
    %180 = vector.extract_strided_slice %169 {offsets = [0, 5], sizes = [1, 10], strides = [1, 1]} : vector<1x19xf32> to vector<1x10xf32>
    %cst_57 = arith.constant dense<0xFF800000> : vector<1xf32>
    %181 = vector.multi_reduction <maximumf>, %180, %cst_57 [1] : vector<1x10xf32> to vector<1xf32>
    %182 = vector.shape_cast %181 : vector<1xf32> to vector<1x1xf32>
    %183 = vector.broadcast %182 : vector<1x1xf32> to vector<1x10xf32>
    %184 = arith.subf %180, %183 : vector<1x10xf32>
    %185 = math.exp %184 : vector<1x10xf32>
    %cst_58 = arith.constant dense<0.000000e+00> : vector<1xf32>
    %186 = vector.multi_reduction <add>, %185, %cst_58 [1] : vector<1x10xf32> to vector<1xf32>
    %187 = vector.shape_cast %186 : vector<1xf32> to vector<1x1xf32>
    %188 = vector.broadcast %187 : vector<1x1xf32> to vector<1x10xf32>
    %189 = arith.divf %185, %188 : vector<1x10xf32>
    %190 = vector.extract_strided_slice %169 {offsets = [0, 15], sizes = [1, 4], strides = [1, 1]} : vector<1x19xf32> to vector<1x4xf32>
    %cst_59 = arith.constant dense<0xFF800000> : vector<1xf32>
    %191 = vector.multi_reduction <maximumf>, %190, %cst_59 [1] : vector<1x4xf32> to vector<1xf32>
    %192 = vector.shape_cast %191 : vector<1xf32> to vector<1x1xf32>
    %193 = vector.broadcast %192 : vector<1x1xf32> to vector<1x4xf32>
    %194 = arith.subf %190, %193 : vector<1x4xf32>
    %195 = math.exp %194 : vector<1x4xf32>
    %cst_60 = arith.constant dense<0.000000e+00> : vector<1xf32>
    %196 = vector.multi_reduction <add>, %195, %cst_60 [1] : vector<1x4xf32> to vector<1xf32>
    %197 = vector.shape_cast %196 : vector<1xf32> to vector<1x1xf32>
    %198 = vector.broadcast %197 : vector<1x1xf32> to vector<1x4xf32>
    %199 = arith.divf %195, %198 : vector<1x4xf32>
    %200 = tpu.concatenate %179, %189, %199 in 1 : vector<1x5xf32>, vector<1x10xf32>, vector<1x4xf32> -> vector<1x19xf32>
    %c0_61 = arith.constant 0 : index
    %c0_62 = arith.constant 0 : index
    %201 = vector.load %arg5[%c0_61, %c0_62] : memref<1x19xf32, #tpu.memory_space<vmem>>, vector<1x19xf32>
    tpu.vector_store %arg5[%c0_61, %c0_62], %200 {strides = array<i32>} : memref<1x19xf32, #tpu.memory_space<vmem>>, vector<1x19xf32>,
    return
  }
}

</mosaic_0001>

<bundles_post_ra>
// kernel: task_gnn_forward.1
= control target key start
LH: loop header
LB: loop body
LE: loop exit
PB: predicated region body
PF: predicated region fallthrough
CT: control target
= control target key end

     0   :  { %10 = vsyncpa [#allocation3], 0  ;;  %s1398_s0 = inlined_call_operand.vmem [shape: f32[8,5], index: 0, kind: input, shape index: {}]   ;;  %s1399_s1 = inlined_call_operand.vmem [shape: s32[2,16], index: 1, kind: input, shape index: {}]   ;;  %s1400_s2 = inlined_call_operand.vmem [shape: s32[1,8], index: 2, kind: input, shape index: {}]   ;;  %s1401_s3 = inlined_call_operand.hbm [shape: f32[16,83], index: 3, kind: input, shape index: {}]   ;;  %s1402_s4 = inlined_call_operand.hbm [shape: f32[11,32], index: 4, kind: input, shape index: {}]   ;;  %s1403_s5 = inlined_call_operand.vmem [shape: f32[1,19], index: 5, kind: output, shape index: {}]  }
   0x1   :  { %11 = vsyncpa [#allocation5], 0  ;;  %s1208_s18 = smov [#allocation2]   ;;  %s1160_s22 = scalar_lea.hbm %s1401_s3, 256 }
   0x2   :  { %s23_s19 = sshll.u32 %s1208_s18, 4  ;;  %p1161_p0 = scmp.ne.s32.totalorder %s1401_s3, %s1160_s22  ;;  %s24_s19 = int_to_ptr.vmem [resolvable:$true] %s23_s19 }
   0x3   :  { %p1164_p1 = scmp.lt.u32.totalorder %s1160_s22, %s1401_s3 }
   0x5   :  { %p1166_p2 = pnand %p1164_p1, %p1161_p0 }
   0x7   :  { %1169 = shalt.err (!%p1166_p2)
}
   0x8   :  { %s1170_s27 = scalar_lea.vmem %s24_s19, 256  ;;  %p1175_p4 = scmp.lt.s32.totalorder %s24_s19, %s24_s19 }
   0x9   :  { %p1171_p3 = scmp.ne.s32.totalorder %s24_s19, %s1170_s27  ;;  %p1176_p5 = scmp.lt.s32.totalorder %s1170_s27, %s1170_s27 }
   0xb   :  { %p1177_p6 = por %p1176_p5, %p1175_p4 }
   0xd   :  { %p1178_p7 = pnand %p1177_p6, %p1171_p3 }
   0xf   :  { %1181 = shalt.err (!%p1178_p7)
}
  0x10   :  { %s1209_s28 = smov 128   ;;  %s1210_s29 = smov 8  }
  0x11   :  { %29 = dma.hbm_to_vmem [thread:$0]  %s1401_s3, 256, %s24_s19, [#allocation3], %s1209_s28, %s1209_s28, %s1210_s29  }
  0x12   :  { %s1211_s7 = smov [#allocation4]   ;;  %s1182_s11 = scalar_lea.hbm %s1402_s4, 256 }
  0x13   :  { %s35_s8 = sshll.u32 %s1211_s7, 4  ;;  %p1183_p8 = scmp.ne.s32.totalorder %s1402_s4, %s1182_s11  ;;  %s36_s8 = int_to_ptr.vmem [resolvable:$true] %s35_s8 }
  0x14   :  { %p1186_p9 = scmp.lt.u32.totalorder %s1182_s11, %s1402_s4 }
  0x16   :  { %p1188_p10 = pnand %p1186_p9, %p1183_p8 }
  0x18   :  { %1191 = shalt.err (!%p1188_p10)
}
  0x19   :  { %s1192_s16 = scalar_lea.vmem %s36_s8, 256  ;;  %p1197_p12 = scmp.lt.s32.totalorder %s36_s8, %s36_s8 }
  0x1a   :  { %p1193_p11 = scmp.ne.s32.totalorder %s36_s8, %s1192_s16  ;;  %p1198_p13 = scmp.lt.s32.totalorder %s1192_s16, %s1192_s16 }
  0x1c   :  { %p1199_p0 = por %p1198_p13, %p1197_p12 }
  0x1e   :  { %p1200_p1 = pnand %p1199_p0, %p1193_p11 }
  0x20   :  { %1203 = shalt.err (!%p1200_p1)
}
  0x21   :  { %41 = dma.hbm_to_vmem [thread:$0]  %s1402_s4, 256, %s36_s8, [#allocation5], %s1209_s28, %s1209_s28, %s1210_s29  }
  0x22   :  { %1204 = dma.done.wait [#allocation3], 256  }
  0x23   :  { %1205 = vsyncadd [#allocation3], 4294967040 }
  0x24   :  { %1206 = dma.done.wait [#allocation5], 256  }
  0x25   :  { %1207 = vsyncadd [#allocation5], 4294967040  ;;  %v1212_v0 = vmov 0.0   ;;  %vm1213_vm0 = vmmov 0   ;;  %v50_v1 = vlaneseq  ;;  %vm176_vm1 = vcmask 1044480   ;;  %v171_v5 = vld [vmem:[%s1398_s0] sm:$0xff] }
  0x26   :  { %1046 = vmatprep.subr.mxu1 %v1212_v0  ;;  %1048 = vmatprep.mubr.msk.f32.mxu1 %vm1213_vm0, %v1212_v0  ;;  %vm172_vm2 = vcmask 39936   ;;  %v161_v4 = vld [vmem:[#allocation2] sm:$0x1f]  ;;  %v165_v6 = vld [vmem:[#allocation4 + $0x2] sm:$0x3]  ;;  %s1214_s19 = smov 16  }
  0x27   :  { %1041 = vmatprep.subr.mxu0 %v1212_v0  ;;  %1043 = vmatprep.mubr.msk.f32.mxu0 %vm1213_vm0, %v1212_v0  ;;  %v1284_v2 = vshrl.u32 %v50_v1, 7  ;;  %v1000_v8 = vld [vmem:[%s1399_s1] ss:$0 sm:$0xff]  ;;  %v998_v9 = vld [vmem:[%s1399_s1 + $0x1] ss:$0 sm:$0xff]  ;;  %vm71_vm4 = vcmask 130048  }
  0x28   :  { %1047 = vmatpush3.msk.msra.mxu1 %vm176_vm1, %v161_v4  ;;  %vm250_vm6 = vcmask 261120   ;;  %v164_v18 = vld [vmem:[#allocation4] sm:$0x3]  ;;  %s1215_s1 = smov 112   ;;  %v67_v27 = vand.u32 127, %v50_v1  ;;  %vm344_vm10 = vcmask 64512  }
  0x29   :  { %v1287_v3 = vsub.s32 1, %v1284_v2  ;;  %1049 = vmatmul.mubr.msk.f32.vlgmr.msra.gmra.mrb[0].mxu1 %vm172_vm2, %v171_v5  ;;  %1051 = vmatprep.subr.mxu1 %v1212_v0  ;;  %vm63_vm3 = vcmp.eq.s32.totalorder %v1284_v2, %v1000_v8  ;;  %vm56_vm5 = vcmp.eq.s32.totalorder %v1284_v2, %v998_v9  ;;  %v1313_v12 = vsub.s32 0, %v1284_v2  ;;  %v162_v58 = vld [vmem:[#allocation2] sm:$0xff]  ;;  %v163_v59 = vld [vmem:[#allocation2 + $0x8] sm:$0xff]  ;;  %s1218_s23 = smov 96   ;;  %s1220_s26 = smov 113  }
  0x2a   :  { %1053 = vmatprep.mubr.msk.f32.mxu1 %vm1213_vm0, %v1212_v0  ;;  %v1001_v10 = vsel %vm63_vm3, 1.0, %v1212_v0  ;;  %v999_v11 = vsel %vm56_vm5, 1.0, %v1212_v0  ;;  %vm68_vm7 = vcmp.eq.s32.totalorder %v1284_v2, %v67_v27  ;;  %v1216_v35 = vmov -1e+30   ;;  %s1221_s27 = smov 123  }
  0x2b   :  { %v359_v7 = vrot.slane %v165_v6, %v1287_v3  ;;  %1042 = vmatpush3.xpose.msk.msra.mxu0 %vm71_vm4, %v1001_v10  ;;  %v330_v13 = vrot.slane %v165_v6, %v1313_v12  ;;  %v1002_v28 = vsel %vm68_vm7, 1.0, %v1212_v0  ;;  %v1217_v56 = vmov 0.0|0.0  }
  0x2c   :  { %1094 = vmatprep.subr.bf16.mxu0 %v1217_v56  ;;  %v1344_v60 = vpack.i.bf16 %v163_v59, %v162_v58  ;;  %vm154_vm15 = vcmask 57344   ;;  %vm953_vm1 = vcmask 114728   ;;  %vm941_vm3 = vcmask 32768  }
  0x2d   :  { %361 = vrot.lane.b32.xlu0 %v359_v7, %s1214_s19  ;;  %vm964_vm5 = vcmask 73728   ;;  %vm990_vm7 = vcmask 147456  }
  0x2e   :  { %1044 = vmatmul.mubr.msk.f32.vlgmr.msra.gmra.mrb[0].mxu0 %vm71_vm4, %v999_v11 }
  0x2f   :  { %1060 = vmatprep.mubr.msk.f32.mxu0 %vm1213_vm0, %v1212_v0 }
  0x9f   :  { %v362_v14 = vpop.permute.xlu0 %361 }
  0xfc   :  { %v1316_v15 = vpop.f32.mrb[0].mxu1 }
  0xfd   :  { %v1050_v16 = vpop.f32.mrb[1].mxu1  ;;  %1052 = vmatpush3.xpose.msk.msra.mxu1 %vm250_vm6, %v1316_v15  ;;  %v364_v17 = vmul.f32 %v362_v14, %v1316_v15  ;;  %v331_v19 = vmul.f32 %v330_v13, %v1316_v15  ;;  %v168_v14 = vld [vmem:[#allocation4 + $0x7] sm:$0x3] }
  0xfe   :  { %1097 = vmatprep.subr.bf16.mxu1 %v1217_v56  ;;  %v1011_v16 = vld [vmem:[#allocation4 + $0x4] ss:$0 sm:$0xff] }
  0xff   :  { %366 = vrot.lane.b32.xlu0 %v364_v17, %s1215_s1  ;;  %v332_v22 = vsel %vm71_vm4, %v331_v19, 0.0 }
 0x100   :  { %1054 = vmatmul.mubr.msk.f32.vlgmr.msra.gmra.mrb[2].mxu1 %vm250_vm6, %v164_v18 }
 0x101   :  { %1067 = vmatprep.mubr.msk.f32.mxu1 %vm1213_vm0, %v1212_v0  ;;  %v144_v23 = vpop.f32.mrb[0].mxu0 }
 0x102   :  { %v1045_v24 = vpop.f32.mrb[1].mxu0  ;;  %v145_v29 = vadd.f32 %v1002_v28, %v144_v23  ;;  %v167_v28 = vld [vmem:[#allocation4 + $0x5] sm:$0x3] }
 0x104   :  { %vm148_vm8 = vcmp.gt.f32.partialorder %v145_v29, 0.0 }
 0x105   :  { %v1332_v36 = vsel %vm148_vm8, 0.0, %v1216_v35 }
 0x171   :  { %v367_v20 = vpop.permute.xlu0 %366 }
 0x172   :  { %v369_v21 = vsel %vm71_vm4, %v367_v20, 0.0 }
 0x173   :  { %370 = vadd.xlane.f32.xlu1 %v369_v21 }
 0x177   :  { %333 = vadd.xlane.f32.xlu1 %v332_v22  ;;  %v640_v22 = vrot.slane %v168_v14, %v1313_v12 }
 0x1d3   :  { %v323_v25 = vpop.f32.mrb[2].mxu1 }
 0x1d4   :  { %v1055_v26 = vpop.f32.mrb[3].mxu1  ;;  %v375_v30 = vrot.slane %v323_v25, %v1287_v3  ;;  %v338_v33 = vrot.slane %v323_v25, %v1313_v12 }
 0x200   :  { %v371_v31 = vpop.xlane.xlu1 %370 }
 0x201   :  { %v376_v32 = vadd.f32 %v375_v30, %v371_v31 }
 0x203   :  { %vm377_vm9 = vcmp.gt.f32.partialorder %v376_v32, 0.0  ;;  %v378_v34 = vmul.f32 0.2, %v376_v32 }
 0x204   :  { %v334_v37 = vpop.xlane.xlu1 %333 }
 0x205   :  { %v339_v38 = vadd.f32 %v338_v33, %v334_v37  ;;  %v379_v39 = vsel %vm377_vm9, %v376_v32, %v378_v34 }
 0x206   :  { %v380_v40 = vadd.f32 %v379_v39, %v1332_v36 }
 0x207   :  { %vm340_vm11 = vcmp.gt.f32.partialorder %v339_v38, 0.0  ;;  %v341_v41 = vmul.f32 0.2, %v339_v38 }
 0x208   :  { %v381_v42 = vsel %vm344_vm10, %v380_v40, -inf }
 0x209   :  { %382 = vmax.xlane.f32.xlu0 %v381_v42  ;;  %v342_v43 = vsel %vm340_vm11, %v339_v38, %v341_v41 }
 0x20a   :  { %v343_v44 = vadd.f32 %v342_v43, %v1332_v36 }
 0x20c   :  { %v345_v45 = vsel %vm344_vm10, %v343_v44, -inf }
 0x20d   :  { %346 = vmax.xlane.f32.xlu1 %v345_v45 }
 0x21f   :  { %1121 = vrot.lane.b32.xlu0 %v1344_v60, %s1218_s23 }
 0x296   :  { %v383_v46 = vpop.xlane.xlu0 %382 }
 0x297   :  { %v384_v47 = vsub.f32 %v380_v40, %v383_v46 }
 0x299   :  { %v385_v48 = vmul.f32 1.442695, %v384_v47 }
 0x29a   :  { %v347_v49 = vpop.xlane.xlu1 %346  ;;  %v1122_v5 = vpop.permute.xlu0 %1121 }
 0x29b   :  { %1130 = vpow2.f32 %v385_v48  ;;  %v348_v50 = vsub.f32 %v343_v44, %v347_v49  ;;  %v1124_v6 = vunpack.i.h.bf16 %v1122_v5  ;;  %v1123_v7 = vunpack.i.l.bf16 %v1122_v5 }
 0x29d   :  { %v349_v51 = vmul.f32 1.442695, %v348_v50  ;;  %v1098_v8 = vpack.c.bf16 %v1124_v6, %v1123_v7 }
 0x29f   :  { %1132 = vpow2.f32 %v349_v51  ;;  %1099 = vmatpush3.bf16.msra.mxu1 %v1098_v8 }
 0x2a0   :  { %1100 = vmatprep.subr.bf16.mxu1 %v1217_v56 }
 0x2a5   :  { %v1131_v52 = vpop.eup %1130 }
 0x2a6   :  { %v387_v53 = vsel %vm344_vm10, %v1131_v52, 0.0 }
 0x2a7   :  { %388 = vadd.xlane.f32.xlu1 %v387_v53 }
 0x2a9   :  { %v1133_v54 = vpop.eup %1132 }
 0x2aa   :  { %v351_v55 = vsel %vm344_vm10, %v1133_v54, 0.0 }
 0x2ab   :  { %352 = vadd.xlane.f32.xlu1 %v351_v55 }
 0x2bc   :  { %397 = vrot.lane.b32.xlu1 %v1316_v15, %s1215_s1 }
 0x334   :  { %v389_v57 = vpop.xlane.xlu1 %388 }
 0x335   :  { %1134 = vrcp.f32 %v389_v57 }
 0x338   :  { %v353_v61 = vpop.xlane.xlu1 %352 }
 0x339   :  { %1136 = vrcp.f32 %v353_v61 }
 0x33c   :  { %v398_v62 = vpop.permute.xlu1 %397 }
 0x33d   :  { %v1095_v63 = vpack.c.bf16 %v398_v62, %v1316_v15  ;;  %v668_v15 = vrot.slane %v168_v14, %v1287_v3 }
 0x33f   :  { %v1135_v1 = vpop.eup %1134  ;;  %1096 = vmatpush3.bf16.msra.mxu0 %v1095_v63  ;;  %v150_v63 = vld [vmem:[%s1400_s2] sm:$0x1]  ;;  %s1219_s2 = smov 64  }
 0x340   :  { %v391_v4 = vmul.f32 %v1135_v1, %v1131_v52  ;;  %1070 = vmatprep.subr.mxu0 %v1212_v0  ;;  %vm151_vm14 = vcmp.eq.s32.totalorder %v1284_v2, %v150_v63 }
 0x341   :  { %v1005_v1 = vsel %vm151_vm14, 1.0, %v1212_v0 }
 0x342   :  { %393 = vrot.lane.b32.xlu1 %v391_v4, %s1210_s29  ;;  %v155_v4 = vsel %vm154_vm15, %v1005_v1, 0.0 }
 0x343   :  { %v1137_v9 = vpop.eup %1136 }
 0x344   :  { %v355_v10 = vmul.f32 %v1137_v9, %v1133_v54 }
 0x346   :  { %670 = vrot.lane.b32.xlu1 %v668_v15, %s1214_s19  ;;  %v1016_v15 = vld [vmem:[#allocation4 + $0x9] ss:$0 sm:$0xff] }
 0x3b4   :  { %v394_v11 = vpop.permute.xlu1 %393 }
 0x3b5   :  { %v396_v13 = vsel %vm344_vm10, %v355_v10, %v394_v11 }
 0x3b6   :  { %1061 = vmatmul.mubr.msk.f32.vlgmr.msra.gmra.mrb[2].mxu0 %vm71_vm4, %v396_v13 }
 0x3b7   :  { %1072 = vmatprep.mubr.msk.f32.mxu0 %vm1213_vm0, %v1212_v0 }
 0x3b8   :  { %v671_v23 = vpop.permute.xlu1 %670 }
 0x489   :  { %v469_v17 = vpop.f32.mrb[2].mxu0 }
 0x48a   :  { %v473_v18 = vmul.f32 0.5, %v469_v17  ;;  %v1062_v19 = vpop.f32.mrb[3].mxu0 }
 0x48c   :  { %v478_v20 = vadd.f32 %v1011_v16, %v473_v18 }
 0x48e   :  { %v479_v21 = vmax.f32 %v478_v20, 0.0 }
 0x490   :  { %1068 = vmatmul.mubr.msk.f32.vlgmr.msra.gmra.mrb[4].mxu1 %vm71_vm4, %v479_v21 }
 0x491   :  { %1079 = vmatprep.mubr.msk.f32.mxu1 %vm1213_vm0, %v1212_v0 }
 0x563   :  { %v557_v24 = vpop.f32.mrb[4].mxu1 }
 0x564   :  { %v1069_v25 = vpop.f32.mrb[5].mxu1  ;;  %1071 = vmatpush3.xpose.msk.msra.mxu0 %vm250_vm6, %v557_v24  ;;  %v673_v26 = vmul.f32 %v671_v23, %v557_v24  ;;  %v641_v27 = vmul.f32 %v640_v22, %v557_v24  ;;  %v170_v23 = vld [vmem:[#allocation4 + $0xa] sm:$0x1] }
 0x565   :  { %1082 = vmatprep.subr.mxu0 %v1212_v0 }
 0x566   :  { %675 = vrot.lane.b32.xlu1 %v673_v26, %s1215_s1  ;;  %v642_v29 = vsel %vm71_vm4, %v641_v27, 0.0 }
 0x567   :  { %643 = vadd.xlane.f32.xlu0 %v642_v29  ;;  %1073 = vmatmul.mubr.msk.f32.vlgmr.msra.gmra.mrb[4].mxu0 %vm250_vm6, %v167_v28  ;;  %vm988_vm6 = vcmask 121856  }
 0x568   :  { %1084 = vmatprep.mubr.msk.f32.mxu0 %vm1213_vm0, %v1212_v0 }
 0x5d8   :  { %v676_v30 = vpop.permute.xlu1 %675 }
 0x5d9   :  { %v678_v31 = vsel %vm71_vm4, %v676_v30, 0.0 }
 0x5da   :  { %679 = vadd.xlane.f32.xlu1 %v678_v31 }
 0x5f4   :  { %v644_v35 = vpop.xlane.xlu0 %643 }
 0x63a   :  { %v633_v32 = vpop.f32.mrb[4].mxu0 }
 0x63b   :  { %v1074_v33 = vpop.f32.mrb[5].mxu0  ;;  %v648_v34 = vrot.slane %v633_v32, %v1313_v12  ;;  %v684_v38 = vrot.slane %v633_v32, %v1287_v3 }
 0x63d   :  { %v649_v37 = vadd.f32 %v648_v34, %v644_v35 }
 0x63f   :  { %v651_v41 = vmul.f32 0.2, %v649_v37  ;;  %vm650_vm12 = vcmp.gt.f32.partialorder %v649_v37, 0.0 }
 0x641   :  { %v652_v44 = vsel %vm650_vm12, %v649_v37, %v651_v41 }
 0x642   :  { %v653_v47 = vadd.f32 %v652_v44, %v1332_v36 }
 0x644   :  { %v654_v12 = vsel %vm344_vm10, %v653_v47, -inf }
 0x667   :  { %v680_v39 = vpop.xlane.xlu1 %679 }
 0x668   :  { %v685_v40 = vadd.f32 %v684_v38, %v680_v39 }
 0x66a   :  { %vm686_vm13 = vcmp.gt.f32.partialorder %v685_v40, 0.0  ;;  %v687_v42 = vmul.f32 0.2, %v685_v40 }
 0x66c   :  { %v688_v43 = vsel %vm686_vm13, %v685_v40, %v687_v42 }
 0x66d   :  { %v689_v45 = vadd.f32 %v688_v43, %v1332_v36 }
 0x66f   :  { %v690_v46 = vsel %vm344_vm10, %v689_v45, -inf }
 0x670   :  { %691 = vmax.xlane.f32.xlu1 %v690_v46 }
 0x674   :  { %655 = vmax.xlane.f32.xlu1 %v654_v12 }
 0x6fd   :  { %v692_v48 = vpop.xlane.xlu1 %691 }
 0x6fe   :  { %v693_v3 = vsub.f32 %v689_v45, %v692_v48 }
 0x700   :  { %v694_v49 = vmul.f32 1.442695, %v693_v3 }
 0x701   :  { %v656_v50 = vpop.xlane.xlu1 %655 }
 0x702   :  { %1138 = vpow2.f32 %v694_v49  ;;  %v657_v51 = vsub.f32 %v653_v47, %v656_v50 }
 0x704   :  { %v658_v52 = vmul.f32 1.442695, %v657_v51 }
 0x706   :  { %1140 = vpow2.f32 %v658_v52 }
 0x70c   :  { %v1139_v53 = vpop.eup %1138 }
 0x70d   :  { %v696_v54 = vsel %vm344_vm10, %v1139_v53, 0.0 }
 0x70e   :  { %697 = vadd.xlane.f32.xlu0 %v696_v54 }
 0x710   :  { %v1141_v55 = vpop.eup %1140 }
 0x711   :  { %v660_v57 = vsel %vm344_vm10, %v1141_v55, 0.0 }
 0x712   :  { %661 = vadd.xlane.f32.xlu1 %v660_v57 }
 0x724   :  { %706 = vrot.lane.b32.xlu0 %v557_v24, %s1215_s1 }
 0x728   :  { %1126 = vrot.lane.b32.xlu0 %v1344_v60, %s1219_s2 }
 0x79b   :  { %v698_v36 = vpop.xlane.xlu0 %697 }
 0x79c   :  { %1142 = vrcp.f32 %v698_v36 }
 0x79f   :  { %v707_v58 = vpop.permute.xlu0 %706  ;;  %v662_v5 = vpop.xlane.xlu1 %661 }
 0x7a0   :  { %v1101_v59 = vpack.c.bf16 %v707_v58, %v557_v24  ;;  %1144 = vrcp.f32 %v662_v5 }
 0x7a2   :  { %1102 = vmatpush3.bf16.msra.mxu1 %v1101_v59 }
 0x7a3   :  { %1103 = vmatprep.subr.bf16.mxu1 %v1217_v56  ;;  %v1127_v10 = vpop.permute.xlu0 %1126 }
 0x7a4   :  { %v1129_v11 = vunpack.i.h.bf16 %v1127_v10  ;;  %v1128_v13 = vunpack.i.l.bf16 %v1127_v10 }
 0x7a6   :  { %v1143_v61 = vpop.eup %1142  ;;  %v1104_v14 = vpack.c.bf16 %v1129_v11, %v1128_v13 }
 0x7a7   :  { %v700_v62 = vmul.f32 %v1143_v61, %v1139_v53 }
 0x7a9   :  { %702 = vrot.lane.b32.xlu1 %v700_v62, %s1210_s29 }
 0x7aa   :  { %v1145_v6 = vpop.eup %1144 }
 0x7ab   :  { %v664_v7 = vmul.f32 %v1145_v6, %v1141_v55 }
 0x7cd   :  { %156 = vadd.xlane.f32.xlu1 %v155_v4 }
 0x81b   :  { %v703_v56 = vpop.permute.xlu1 %702 }
 0x81c   :  { %v705_v8 = vsel %vm344_vm10, %v664_v7, %v703_v56 }
 0x81d   :  { %1080 = vmatmul.mubr.msk.f32.vlgmr.msra.gmra.mrb[6].mxu1 %vm71_vm4, %v705_v8 }
 0x81e   :  { %1091 = vmatprep.mubr.msk.f32.mxu1 %vm1213_vm0, %v1212_v0  ;;  %1105 = vmatpush3.bf16.msra.mxu1 %v1104_v14  ;;  %vm970_vm0 = vcmask 147576  }
 0x85a   :  { %v157_v2 = vpop.xlane.xlu1 %156 }
 0x85b   :  { %v158_v9 = vmax.f32 %v157_v2, 1.0 }
 0x85d   :  { %1146 = vrcp.f32 %v158_v9 }
 0x867   :  { %v1147_v17 = vpop.eup %1146 }
 0x868   :  { %v160_v21 = vmul.f32 %v1147_v17, %v1005_v1 }
 0x8f0   :  { %v778_v16 = vpop.f32.mrb[6].mxu1 }
 0x8f1   :  { %v782_v18 = vmul.f32 0.5, %v778_v16  ;;  %v1081_v19 = vpop.f32.mrb[7].mxu1 }
 0x8f3   :  { %v787_v20 = vadd.f32 %v1016_v15, %v782_v18 }
 0x8f5   :  { %v788_v22 = vmax.f32 %v787_v20, 0.0 }
 0x8f7   :  { %1083 = vmatpush3.msra.mxu0 %v788_v22 }
 0x8f8   :  { %1085 = vmatmul.mubr.msk.f32.vlgmr.msra.gmra.mrb[6].mxu0 %vm344_vm10, %v160_v21 }
 0x9cb   :  { %v858_v0 = vpop.f32.mrb[6].mxu0 }
 0x9cc   :  { %1092 = vmatmul.mubr.msk.f32.vlgmr.msra.gmra.mrb[8].mxu1 %vm71_vm4, %v858_v0  ;;  %v1086_v60 = vpop.f32.mrb[7].mxu0  ;;  %vm981_vm4 = vcmask 24576  }
 0xa9f   :  { %v937_v24 = vpop.f32.mrb[8].mxu1 }
 0xaa0   :  { %v938_v25 = vadd.f32 %v937_v24, %v170_v23  ;;  %v1093_v26 = vpop.f32.mrb[9].mxu1 }
 0xaa2   :  { %v971_v27 = vsel %vm970_vm0, %v938_v25, -inf  ;;  %v954_v28 = vsel %vm953_vm1, %v938_v25, -inf  ;;  %v942_v29 = vsel %vm941_vm3, %v938_v25, -inf }
 0xaa3   :  { %972 = vmax.xlane.f32.xlu1 %v971_v27  ;;  %955 = vmax.xlane.f32.xlu0 %v954_v28 }
 0xaa7   :  { %943 = vmax.xlane.f32.xlu0 %v942_v29 }
 0xb30   :  { %v973_v30 = vpop.xlane.xlu1 %972  ;;  %v956_v31 = vpop.xlane.xlu0 %955 }
 0xb31   :  { %v974_v32 = vsub.f32 %v938_v25, %v973_v30  ;;  %v957_v33 = vsub.f32 %v938_v25, %v956_v31 }
 0xb33   :  { %v975_v34 = vmul.f32 1.442695, %v974_v32  ;;  %v958_v35 = vmul.f32 1.442695, %v957_v33 }
 0xb34   :  { %v944_v39 = vpop.xlane.xlu0 %943 }
 0xb35   :  { %1148 = vpow2.f32 %v975_v34  ;;  %v945_v40 = vsub.f32 %v938_v25, %v944_v39 }
 0xb36   :  { %1150 = vpow2.f32 %v958_v35 }
 0xb37   :  { %v946_v41 = vmul.f32 1.442695, %v945_v40 }
 0xb39   :  { %1152 = vpow2.f32 %v946_v41 }
 0xb3f   :  { %v1149_v37 = vpop.eup %1148 }
 0xb40   :  { %v1151_v38 = vpop.eup %1150  ;;  %978 = vrot.lane.b32.xlu0 %v1149_v37, %s1220_s26 }
 0xb41   :  { %961 = vrot.lane.b32.xlu1 %v1151_v38, %s1221_s27 }
 0xb43   :  { %v1153_v42 = vpop.eup %1152 }
 0xb44   :  { %v948_v43 = vsel %vm941_vm3, %v1153_v42, 0.0 }
 0xb65   :  { %949 = vadd.xlane.f32.xlu1 %v948_v43 }
 0xbb2   :  { %v979_v44 = vpop.permute.xlu0 %978 }
 0xbb3   :  { %v962_v45 = vpop.permute.xlu1 %961  ;;  %v982_v46 = vsel %vm981_vm4, %v979_v44, 0.0 }
 0xbb4   :  { %v965_v47 = vsel %vm964_vm5, %v962_v45, 0.0  ;;  %983 = vadd.xlane.f32.xlu1 %v982_v46 }
 0xbb5   :  { %966 = vadd.xlane.f32.xlu0 %v965_v47 }
 0xbf2   :  { %v950_v12 = vpop.xlane.xlu1 %949 }
 0xbf3   :  { %1154 = vrcp.f32 %v950_v12 }
 0xbfd   :  { %v1155_v49 = vpop.eup %1154 }
 0xbfe   :  { %v952_v53 = vmul.f32 %v1155_v49, %v1153_v42 }
 0xc41   :  { %v984_v48 = vpop.xlane.xlu1 %983 }
 0xc42   :  { %1156 = vrcp.f32 %v984_v48  ;;  %v967_v3 = vpop.xlane.xlu0 %966 }
 0xc43   :  { %1158 = vrcp.f32 %v967_v3 }
 0xc4c   :  { %v1157_v50 = vpop.eup %1156 }
 0xc4d   :  { %v1159_v51 = vpop.eup %1158  ;;  %v986_v52 = vmul.f32 %v1157_v50, %v1149_v37 }
 0xc4e   :  { %v969_v54 = vmul.f32 %v1159_v51, %v1151_v38 }
 0xc50   :  { %v987_v55 = vsel %vm172_vm2, %v952_v53, %v969_v54 }
 0xc51   :  { %v989_v57 = vsel %vm988_vm6, %v987_v55, %v986_v52 }
 0xc52   :  { %991 = vst.msk [vmem:[%s1403_s5] sm:$0x1] %vm990_vm7, %v989_v57 }
 0xc53   :  { %996 = vsyncpa [#allocation3], 1 }
 0xc54   :  { %997 = vsyncpa [#allocation5], 1 }

</bundles_post_ra>
